<compile_context>
chip_gen: v7x
topology: tpu7x:2x2x1
jax: 0.10.0
libtpu: 0.0.40
codegen_flags: <defaults>
</compile_context>

<pallas_src>
import functools

import jax
import jax.numpy as jnp
from jax import lax
from jax.experimental import pallas as pl
from jax.experimental.pallas import tpu as pltpu

_TARGET_OUT_BLOCK_BYTES = 2 << 20   # ~2 MiB output per grid step (review item 1)
_ONEHOT_MAX_V = 128                 # above this the one-hot matmul stops being writeback-bound
_GATHER_INFLIGHT = 8                # outstanding row DMAs in the HBM-gather path
_MIN_SPLIT_TOKENS = 512             # only split a single block for megacore if N >= this


def _round_up(x, m):
    return ((x + m - 1) // m) * m


def _min_sublane(dtype):
    itemsize = jnp.dtype(dtype).itemsize
    if itemsize >= 4:
        return 8
    if itemsize == 2:
        return 16
    return 32


def _vmem_capacity_bytes():
    """Per-core VMEM capacity; conservative 64 MiB (v7x) if the query fails."""
    try:
        info = pltpu.get_tpu_info()
        cap = getattr(info, "vmem_capacity_bytes", None)
        if cap:
            return int(cap)
    except Exception:
        pass
    return 64 * 1024 * 1024


def _choose_tokens_per_block(n_tokens, row_out_bytes, sub, per_token_vmem,
                             fixed_vmem, budget):
    # Size by output bytes (~2 MiB), floor of 256 tokens, never (much) more
    # than the token count, and capped by the VMEM budget.
    t = _round_up(max(_TARGET_OUT_BLOCK_BYTES // max(row_out_bytes, 1), 1), sub)
    t = max(t, 256)
    t = min(t, _round_up(n_tokens, sub))
    t_budget = max((budget - fixed_vmem) // max(per_token_vmem, 1), sub)
    t = min(t, max((t_budget // sub) * sub, sub))
    # Keep both v7x TensorCores busy when there is enough work for two blocks.
    if pl.cdiv(n_tokens, t) == 1 and n_tokens >= _MIN_SPLIT_TOKENS:
        t = _round_up(pl.cdiv(n_tokens, 2), sub)
    return int(t)


# ---------------------------------------------------------------------------
# Path 1: small vocab -> VMEM-resident table, one-hot gather on the MXU.
# ---------------------------------------------------------------------------

def _onehot_embed_kernel(idx_ref, table_ref, o_ref, *, precision):
    # idx_ref   : VMEM (T, 1) int32  -- token ids for this block
    # table_ref : VMEM (V, D)        -- full (small) embedding table, resident
    # o_ref     : VMEM (T, D)
    ids = idx_ref[...]                                   # (T, 1)
    t = o_ref.shape[0]
    v = table_ref.shape[0]
    # Fused iota-compare -> one-hot in the table dtype (single (T, V) temp);
    # the MXU contracts it against the resident table (bf16xbf16 -> f32 for
    # bf16 tables; f32 tables use HIGHEST precision so the lookup is exact).
    onehot = (lax.broadcasted_iota(jnp.int32, (t, v), 1) == ids
              ).astype(table_ref.dtype)
    gathered = jnp.dot(onehot, table_ref[...],
                       preferred_element_type=jnp.float32,
                       precision=precision)
    o_ref[...] = gathered.astype(o_ref.dtype)


def _embed_onehot(idx, table, n_tokens):
    v, d = table.shape
    dtype = table.dtype
    itemsize = jnp.dtype(dtype).itemsize
    sub = _min_sublane(dtype)
    budget = int(0.85 * _vmem_capacity_bytes())

    v_pad = max(_round_up(v, 128), 128)
    per_token = (2 * d * itemsize        # output block, double-buffered
                 + d * 4                 # f32 accumulator before the astype
                 + v_pad * itemsize      # one-hot (T, V) temporary (lane-padded)
                 + v_pad * 4             # iota/compare temporary headroom
                 + 2 * 128 * 4)          # (T, 1) int32 idx block, double-buffered
    fixed = 2 * v * d * itemsize + (4 << 20)   # double-buffered table + scratch headroom

    t = _choose_tokens_per_block(n_tokens, d * itemsize, sub, per_token, fixed, budget)
    grid = pl.cdiv(n_tokens, t)
    n_pad = grid * t
    if n_pad != n_tokens:
        # Padded ids gather row 0; their rows are clipped at writeback since
        # out_shape is exactly (N, D).
        idx = jnp.pad(idx, (0, n_pad - n_tokens))
    idx2d = idx.reshape(n_pad, 1)

    vmem_limit = int(min(budget, max(fixed + per_token * t, 32 << 20)))
    precision = (lax.Precision.HIGHEST
                 if jnp.dtype(dtype) == jnp.dtype(jnp.float32) else None)

    cost = pl.CostEstimate(
        flops=2 * n_pad * v * d,
        transcendentals=0,
        bytes_accessed=n_pad * 4 + v * d * itemsize + n_tokens * d * itemsize,
    )

    return pl.pallas_call(
        functools.partial(_onehot_embed_kernel, precision=precision),
        out_shape=jax.ShapeDtypeStruct((n_tokens, d), dtype),
        grid=(grid,),
        in_specs=[
            pl.BlockSpec((t, 1), lambda i: (i, 0)),    # per-block token ids
            pl.BlockSpec((v, d), lambda i: (0, 0)),    # small table resident in VMEM
        ],
        out_specs=pl.BlockSpec((t, d), lambda i: (i, 0)),
        compiler_params=pltpu.CompilerParams(
            dimension_semantics=("parallel",),
            vmem_limit_bytes=vmem_limit,
        ),
        cost_estimate=cost,
    )(idx2d, table)


# ---------------------------------------------------------------------------
# Path 2: larger vocab -> table stays in HBM, manual per-row DMA gather.
# ---------------------------------------------------------------------------

def _dma_gather_kernel(idx_ref, table_ref, o_ref, buf_ref, sem):
    # idx_ref   : SMEM (Np,) int32  -- all token ids (scalar prefetch)
    # table_ref : HBM  (V, D)       -- memory_space=pl.ANY, never fully copied
    # o_ref     : VMEM (T, D)       -- output block
    # buf_ref   : VMEM (T, D)       -- DMA landing buffer
    # sem       : DMA semaphores (INFLIGHT,) -- bounds outstanding row copies
    t_block = o_ref.shape[0]
    base = pl.program_id(0) * t_block

    def row_copy(t, slot):
        row = idx_ref[base + t]
        return pltpu.make_async_copy(
            table_ref.at[pl.ds(row, 1), :],
            buf_ref.at[pl.ds(t, 1), :],
            sem.at[slot])

    def issue(t, carry):
        slot = t % _GATHER_INFLIGHT
        # Retire the copy that used this slot INFLIGHT steps ago before reuse.
        @pl.when(t >= _GATHER_INFLIGHT)
        def _():
            row_copy(t - _GATHER_INFLIGHT, slot).wait()
        row_copy(t, slot).start()
        return carry

    lax.fori_loop(0, t_block, issue, 0)

    def drain(t, carry):
        row_copy(t, t % _GATHER_INFLIGHT).wait()
        return carry

    lax.fori_loop(max(0, t_block - _GATHER_INFLIGHT), t_block, drain, 0)

    o_ref[...] = buf_ref[...]


def _embed_gather(idx, table, n_tokens):
    v, d = table.shape
    dtype = table.dtype
    itemsize = jnp.dtype(dtype).itemsize
    sub = _min_sublane(dtype)
    budget = int(0.85 * _vmem_capacity_bytes())

    per_token = 3 * d * itemsize          # out double buffer + landing buffer
    fixed = 4 << 20                       # internal scratch headroom

    t = _choose_tokens_per_block(n_tokens, d * itemsize, sub, per_token, fixed, budget)
    grid = pl.cdiv(n_tokens, t)
    n_pad = grid * t
    if n_pad != n_tokens:
        idx = jnp.pad(idx, (0, n_pad - n_tokens))   # padded rows gather row 0; clipped at writeback

    vmem_limit = int(min(budget, max(fixed + per_token * t, 32 << 20)))

    cost = pl.CostEstimate(
        flops=0,
        transcendentals=0,
        bytes_accessed=n_pad * 4 + 2 * n_tokens * d * itemsize,
    )

    # TODO(synk): for extremely large N, chunk the scalar-prefetched index
    # vector (SMEM 1D arrays pad to the next power of two) instead of
    # prefetching all of it at once.
    grid_spec = pltpu.PrefetchScalarGridSpec(
        num_scalar_prefetch=1,
        grid=(grid,),
        in_specs=[pl.BlockSpec(memory_space=pl.ANY)],          # table stays in HBM
        out_specs=pl.BlockSpec((t, d), lambda i, idx_ref: (i, 0)),
        scratch_shapes=[
            pltpu.VMEM((t, d), dtype),
            pltpu.SemaphoreType.DMA((_GATHER_INFLIGHT,)),
        ],
    )

    return pl.pallas_call(
        _dma_gather_kernel,
        out_shape=jax.ShapeDtypeStruct((n_tokens, d), dtype),
        grid_spec=grid_spec,
        compiler_params=pltpu.CompilerParams(
            dimension_semantics=("parallel",),
            vmem_limit_bytes=vmem_limit,
        ),
        cost_estimate=cost,
    )(idx, table)


# ---------------------------------------------------------------------------
# Public entry point (== BpEmbed.forward).
# ---------------------------------------------------------------------------

def bp_embed(x, table):
    """Embedding lookup. x: int indices (any shape); table: (V, D).

    Returns array of shape x.shape + (D,) with table.dtype.
    """
    orig_shape = x.shape
    v, d = table.shape
    # VMEM / DMA reads are not bounds-checked; clamp like jnp.take does.
    idx = jnp.clip(x.reshape(-1).astype(jnp.int32), 0, v - 1)
    n_tokens = int(idx.shape[0])

    budget = int(0.85 * _vmem_capacity_bytes())
    table_bytes = v * d * jnp.dtype(table.dtype).itemsize
    use_onehot = (jnp.issubdtype(table.dtype, jnp.floating)
                  and v <= _ONEHOT_MAX_V
                  and 2 * table_bytes <= budget // 4)

    if use_onehot:
        out = _embed_onehot(idx, table, n_tokens)
    else:
        out = _embed_gather(idx, table, n_tokens)
    return out.reshape(*orig_shape, d)


# TODO(synk): disembed / disembed_batch / nn (nearest-neighbor decode + text
# decode via the SentencePiece processor) are host-side numpy/text utilities
# outside the forward pass; not ported.


if __name__ == "__main__":
    key = jax.random.PRNGKey(0)
    k_tab, k_idx, k_tab2, k_idx2 = jax.random.split(key, 4)

    B, S = 2, 8          # batch, sequence length

    # Case 1: small vocab (hparams['embed_symbols']=32, dim=128)
    # -> VMEM-resident table + one-hot MXU gather path.
    V, D = 32, 128
    table = jax.random.normal(k_tab, (V, D), dtype=jnp.float32)
    x = jax.random.randint(k_idx, (B, S), 0, V, dtype=jnp.int32)
    y = jax.block_until_ready(bp_embed(x, table))
    ref = jnp.take(table, x, axis=0)
    assert y.shape == (B, S, D), y.shape
    assert y.dtype == table.dtype
    assert bool(jnp.allclose(y, ref)), "one-hot path mismatch vs reference gather"

    # Case 2: larger vocab -> HBM table + manual DMA row-gather path.
    V2, D2 = 2048, 128
    table2 = jax.random.normal(k_tab2, (V2, D2), dtype=jnp.float32)
    x2 = jax.random.randint(k_idx2, (B, S), 0, V2, dtype=jnp.int32)
    y2 = jax.block_until_ready(bp_embed(x2, table2))
    ref2 = jnp.take(table2, x2, axis=0)
    assert y2.shape == (B, S, D2), y2.shape
    assert y2.dtype == table2.dtype
    assert bool(jnp.array_equal(y2, ref2)), "DMA-gather path mismatch vs reference gather"

    print("KERNEL_OK")
</pallas_src>

<mosaic_0001>
module attributes {stable_mosaic.version = 11 : i64} {
  func.func @_onehot_embed_kernel(%arg0: i32, %arg1: memref<16x1xi32, #tpu.memory_space<vmem>>, %arg2: memref<32x128xf32, #tpu.memory_space<vmem>>, %arg3: memref<16x128xf32, #tpu.memory_space<vmem>>) attributes {dimension_semantics = [#tpu.dimension_semantics<parallel>], iteration_bounds = array<i64: 1>, scalar_prefetch = 0 : i64, scratch_operands = 0 : i64, tpu.core_type = #tpu.core_type<tc>, window_params = [{transform_indices = @transform_0, window_bounds = array<i64: 16, 1>}, {pipeline_mode = #tpu.pipeline_mode<synchronous>, transform_indices = @transform_1, window_bounds = array<i64: 32, 128>}, {transform_indices = @transform_2, window_bounds = array<i64: 16, 128>}]} {
    %c0 = arith.constant 0 : index
    %c0_0 = arith.constant 0 : index
    %0 = vector.load %arg1[%c0, %c0_0] : memref<16x1xi32, #tpu.memory_space<vmem>>, vector<16x1xi32>
    %1 = tpu.iota {dimensions = array<i32: 1>} : vector<16x32xi32>
    %2 = vector.broadcast %0 : vector<16x1xi32> to vector<16x32xi32>
    %3 = arith.cmpi eq, %1, %2 : vector<16x32xi32>
    %4 = arith.extui %3 : vector<16x32xi1> to vector<16x32xi32>
    %5 = arith.sitofp %4 : vector<16x32xi32> to vector<16x32xf32>
    %c0_1 = arith.constant 0 : index
    %c0_2 = arith.constant 0 : index
    %6 = vector.load %arg2[%c0_1, %c0_2] : memref<32x128xf32, #tpu.memory_space<vmem>>, vector<32x128xf32>
    %cst = arith.constant dense<0.000000e+00> : vector<16x128xf32>
    %7 = tpu.matmul %5, %6, %cst {dimension_numbers = #tpu.dot_dimension_numbers<[1], [0], [0], [1], [0, 0, 1, 1], [], []>, precision = #tpu.contract_precision<fp32>} : vector<16x32xf32>, vector<32x128xf32>, vector<16x128xf32> -> vector<16x128xf32>
    %c0_3 = arith.constant 0 : index
    %c0_4 = arith.constant 0 : index
    %8 = vector.load %arg3[%c0_3, %c0_4] : memref<16x128xf32, #tpu.memory_space<vmem>>, vector<16x128xf32>
    tpu.vector_store %arg3[%c0_3, %c0_4], %7 {strides = array<i32>} : memref<16x128xf32, #tpu.memory_space<vmem>>, vector<16x128xf32>,
    return
  }
  func.func @transform_0(%arg0: i32) -> (i32, i32) {
    %c0_i32 = arith.constant 0 : i32
    %c0_i32_0 = arith.constant 0 : i32
    return %arg0, %c0_i32 : i32, i32
  }
  func.func @transform_1(%arg0: i32) -> (i32, i32) {
    %c0_i32 = arith.constant 0 : i32
    %c0_i32_0 = arith.constant 0 : i32
    %c0_i32_1 = arith.constant 0 : i32
    return %c0_i32, %c0_i32_0 : i32, i32
  }
  func.func @transform_2(%arg0: i32) -> (i32, i32) {
    %c0_i32 = arith.constant 0 : i32
    %c0_i32_0 = arith.constant 0 : i32
    return %arg0, %c0_i32 : i32, i32
  }
}

</mosaic_0001>

<bundles_post_ra>
// kernel: tpu_custom_call.1
= control target key start
LH: loop header
LB: loop body
LE: loop exit
PB: predicated region body
PF: predicated region fallthrough
CT: control target
= control target key end

     0   :  { %7 = vsyncpa [#allocation3], 0  ;;  %s904_s0 = inlined_call_operand.vmem [shape: s32[16,1], index: 0, kind: input, shape index: {}]   ;;  %s905_s1 = inlined_call_operand.hbm [shape: f32[32,128], index: 1, kind: input, shape index: {}]   ;;  %s906_s2 = inlined_call_operand.hbm [shape: f32[16,128], index: 2, kind: output, shape index: {}]  }
   0x1   :  { %8 = vsyncpa [#allocation4], 0  ;;  %s823_s9 = smov [#allocation2]   ;;  %s775_s13 = scalar_lea.hbm %s905_s1, 512 }
   0x2   :  { %s16_s10 = sshll.u32 %s823_s9, 4  ;;  %p776_p0 = scmp.ne.s32.totalorder %s905_s1, %s775_s13  ;;  %s17_s10 = int_to_ptr.vmem [resolvable:$true] %s16_s10 }
   0x3   :  { %p779_p1 = scmp.lt.u32.totalorder %s775_s13, %s905_s1 }
   0x5   :  { %p781_p2 = pnand %p779_p1, %p776_p0 }
   0x7   :  { %784 = shalt.err (!%p781_p2)
}
   0x8   :  { %s785_s18 = scalar_lea.vmem %s17_s10, 512  ;;  %p790_p4 = scmp.lt.s32.totalorder %s17_s10, %s17_s10 }
   0x9   :  { %p786_p3 = scmp.ne.s32.totalorder %s17_s10, %s785_s18  ;;  %p791_p5 = scmp.lt.s32.totalorder %s785_s18, %s785_s18 }
   0xb   :  { %p792_p6 = por %p791_p5, %p790_p4 }
   0xd   :  { %p793_p7 = pnand %p792_p6, %p786_p3 }
   0xf   :  { %796 = shalt.err (!%p793_p7)
}
  0x10   :  { %s824_s19 = smov 128   ;;  %s825_s20 = smov 8  }
  0x11   :  { %22 = dma.hbm_to_vmem [thread:$0]  %s905_s1, 512, %s17_s10, [#allocation3], %s824_s19, %s824_s19, %s825_s20  }
  0x12   :  { %819 = dma.done.wait [#allocation3], 512  }
  0x13   :  { %820 = vsyncadd [#allocation3], 4294966784  ;;  %v826_v0 = vmov 0   ;;  %v26_v1 = vld [vmem:[%s904_s0] sm:$0xff]  ;;  %v43_v3 = vld [vmem:[#allocation2 + $0x8] sm:$0xff]  ;;  %v28_v35 = vlaneseq  ;;  %vm46_vm0 = vcmask 261120  }
  0x14   :  { %774 = vset.pattern.permute.xlu0 %v826_v0  ;;  %v42_v2 = vld [vmem:[#allocation2] sm:$0xff]  ;;  %v27_v5 = vld [vmem:[%s904_s0 + $0x8] sm:$0xff]  ;;  %v57_v6 = vand.u32 4294901760, %v43_v3  ;;  %v44_v7 = vld [vmem:[#allocation2 + $0x10] sm:$0xff]  ;;  %v827_v38 = vmov 0.0   ;;  %s828_s0 = smov [#allocation5]  }
  0x15   :  { %31 = vperm.xlu0 %774, %v26_v1   ;;  %v54_v4 = vand.u32 4294901760, %v42_v2  ;;  %v45_v8 = vld [vmem:[#allocation2 + $0x18] sm:$0xff]  ;;  %v60_v10 = vand.u32 4294901760, %v44_v7  ;;  %v29_v36 = vand.u32 127, %v28_v35  ;;  %s588_s1 = sshll.u32 %s828_s0, 4  ;;  %s589_s1 = int_to_ptr.vmem [resolvable:$true] %s588_s1 }
  0x16   :  { %v63_v11 = vand.u32 4294901760, %v45_v8  ;;  %v151_v14 = vsub.f32 %v43_v3, %v57_v6  ;;  %s797_s27 = scalar_lea.vmem %s589_s1, 256  ;;  %p802_p9 = scmp.lt.s32.totalorder %s589_s1, %s589_s1 }
  0x17   :  { %v865_v9 = vpack.c.bf16 %v57_v6, %v54_v4  ;;  %v144_v13 = vsub.f32 %v42_v2, %v54_v4  ;;  %v158_v20 = vsub.f32 %v44_v7, %v60_v10  ;;  %p798_p8 = scmp.ne.s32.totalorder %s589_s1, %s797_s27  ;;  %p803_p10 = scmp.lt.s32.totalorder %s797_s27, %s797_s27 }
  0x18   :  { %v869_v12 = vpack.c.bf16 %v63_v11, %v60_v10  ;;  %v152_v16 = vand.u32 4294901760, %v151_v14  ;;  %v165_v21 = vsub.f32 %v45_v8, %v63_v11 }
  0x19   :  { %34 = vperm.xlu0 %774, %v27_v5   ;;  %735 = vmatprep.subr.bf16.mxu0 %v865_v9  ;;  %v145_v15 = vand.u32 4294901760, %v144_v13  ;;  %v159_v24 = vand.u32 4294901760, %v158_v20  ;;  %v726_v33 = vpack.c.bf16 %v151_v14, %v144_v13  ;;  %p804_p11 = por %p803_p10, %p802_p9 }
  0x1a   :  { %711 = vmatprep.subr.bf16.mxu1 %v865_v9  ;;  %737 = vmatpush3.bf16.msra.mxu0 %v865_v9  ;;  %v153_v19 = vsub.f32 %v151_v14, %v152_v16  ;;  %v166_v25 = vand.u32 4294901760, %v165_v21  ;;  %v730_v34 = vpack.c.bf16 %v165_v21, %v158_v20 }
  0x1b   :  { %713 = vmatpush3.bf16.msra.mxu1 %v865_v9  ;;  %739 = vmatprep.subr.bf16.mxu0 %v869_v12  ;;  %v742_v17 = vpack.c.bf16 %v152_v16, %v145_v15  ;;  %v146_v18 = vsub.f32 %v144_v13, %v145_v15  ;;  %v160_v28 = vsub.f32 %v158_v20, %v159_v24  ;;  %p805_p12 = pnand %p804_p11, %p798_p8 }
  0x1c   :  { %715 = vmatprep.subr.bf16.mxu1 %v869_v12  ;;  %v154_v23 = vand.u32 4294901760, %v153_v19  ;;  %v746_v27 = vpack.c.bf16 %v166_v25, %v159_v24  ;;  %v167_v29 = vsub.f32 %v165_v21, %v166_v25 }
  0x1d   :  { %v147_v22 = vand.u32 4294901760, %v146_v18  ;;  %v161_v30 = vand.u32 4294901760, %v160_v28 }
  0x1e   :  { %741 = vmatpush3.bf16.msra.mxu0 %v869_v12  ;;  %v168_v31 = vand.u32 4294901760, %v167_v29 }
  0x1f   :  { %717 = vmatpush3.bf16.msra.mxu1 %v869_v12  ;;  %743 = vmatprep.subr.bf16.mxu0 %v742_v17  ;;  %v718_v26 = vpack.c.bf16 %v154_v23, %v147_v22 }
  0x20   :  { %v722_v32 = vpack.c.bf16 %v168_v31, %v161_v30 }
  0x21   :  { %719 = vmatprep.subr.bf16.mxu1 %v718_v26 }
  0x94   :  { %v32_v37 = vpop.permute.xlu0 %31 }
  0x95   :  { %vm36_vm1 = vcmp.eq.s32.totalorder %v29_v36, %v32_v37 }
  0x96   :  { %v600_v39 = vsel %vm36_vm1, 1.0, %v827_v38 }
  0x97   :  { %v48_v40 = vsel %vm46_vm0, %v600_v39, 0 }
  0x98   :  { %v123_v41 = vsub.f32 %v48_v40, %v48_v40  ;;  %v35_v42 = vpop.permute.xlu0 %34 }
  0x99   :  { %vm37_vm2 = vcmp.eq.s32.totalorder %v29_v36, %v35_v42 }
  0x9a   :  { %v601_v43 = vsel %vm37_vm2, 1.0, %v827_v38  ;;  %v124_v44 = vand.u32 4294901760, %v123_v41 }
  0x9b   :  { %v51_v45 = vsel %vm46_vm0, %v601_v43, 0 }
  0x9c   :  { %v133_v46 = vsub.f32 %v51_v45, %v51_v45  ;;  %685 = vmatprep.mubr.f32.mxu0 %v124_v44  ;;  %v125_v47 = vsub.f32 %v123_v41, %v124_v44 }
  0x9e   :  { %v126_v48 = vand.u32 4294901760, %v125_v47  ;;  %v134_v49 = vand.u32 4294901760, %v133_v46 }
  0xa0   :  { %652 = vmatprep.mubr.f32.mxu1 %v126_v48  ;;  %686 = vmatmul.mubr.f32.vlgmr.msra.gmra.mrb[0].mxu0 %v134_v49  ;;  %v135_v50 = vsub.f32 %v133_v46, %v134_v49 }
  0xa1   :  { %745 = vmatpush3.bf16.msra.mxu0 %v742_v17  ;;  %696 = vmatprep.mubr.msk.f32.mxu0 %vm46_vm0, %v600_v39 }
  0xa2   :  { %v136_v51 = vand.u32 4294901760, %v135_v50  ;;  %747 = vmatprep.subr.bf16.mxu0 %v746_v27 }
  0xa4   :  { %653 = vmatmul.mubr.f32.vlgmr.msra.gmra.mrb[0].mxu1 %v136_v51 }
  0xa5   :  { %721 = vmatpush3.bf16.msra.mxu1 %v718_v26  ;;  %663 = vmatprep.mubr.msk.f32.mxu1 %vm46_vm0, %v600_v39 }
  0xa6   :  { %749 = vmatpush3.bf16.msra.mxu0 %v746_v27  ;;  %723 = vmatprep.subr.bf16.mxu1 %v722_v32 }
  0xa7   :  { %751 = vmatprep.subr.bf16.mxu0 %v865_v9 }
  0xa9   :  { %725 = vmatpush3.bf16.msra.mxu1 %v722_v32  ;;  %697 = vmatmul.mubr.msk.f32.vlgmr.msra.gmra.mrb[0].mxu0 %vm46_vm0, %v601_v43 }
  0xaa   :  { %753 = vmatpush3.bf16.msra.mxu0 %v865_v9  ;;  %707 = vmatprep.mubr.msk.f32.mxu0 %vm46_vm0, %v600_v39 }
  0xab   :  { %727 = vmatprep.subr.bf16.mxu1 %v726_v33  ;;  %755 = vmatprep.subr.bf16.mxu0 %v869_v12 }
  0xac   :  { %664 = vmatmul.mubr.msk.f32.vlgmr.msra.gmra.mrb[0].mxu1 %vm46_vm0, %v601_v43 }
  0xad   :  { %729 = vmatpush3.bf16.msra.mxu1 %v726_v33  ;;  %674 = vmatprep.mubr.f32.mxu1 %v123_v41 }
  0xae   :  { %757 = vmatpush3.bf16.msra.mxu0 %v869_v12  ;;  %731 = vmatprep.subr.bf16.mxu1 %v730_v34 }
  0xb1   :  { %733 = vmatpush3.bf16.msra.mxu1 %v730_v34  ;;  %708 = vmatmul.mubr.msk.f32.vlgmr.msra.gmra.mrb[0].mxu0 %vm46_vm0, %v601_v43 }
  0xb4   :  { %675 = vmatmul.mubr.f32.vlgmr.msra.gmra.mrb[0].mxu1 %v133_v46 }
 0x184   :  { %v709_v52 = vpop.f32.mrb[0].mxu0 }
 0x185   :  { %v571_v53 = vpop.f32.mrb[1].mxu0 }
 0x187   :  { %v676_v54 = vpop.f32.mrb[0].mxu1 }
 0x188   :  { %v758_v55 = vadd.f32 %v709_v52, %v676_v54  ;;  %v315_v56 = vpop.f32.mrb[1].mxu1 }
 0x189   :  { %v759_v57 = vadd.f32 %v571_v53, %v315_v56 }
 0x18a   :  { %582 = vst [vmem:[#allocation5 + $0x8] sm:$0xff] %v758_v55 }
 0x18b   :  { %581 = vst [vmem:[#allocation5] sm:$0xff] %v759_v57 }
 0x18c   :  { %808 = shalt.err (!%p805_p12)
}
 0x18d   :  { %s809_s30 = scalar_lea.hbm %s906_s2, 256 }
 0x18e   :  { %p810_p13 = scmp.ne.s32.totalorder %s906_s2, %s809_s30  ;;  %p813_p0 = scmp.lt.u32.totalorder %s809_s30, %s906_s2 }
 0x190   :  { %p815_p1 = pnand %p813_p0, %p810_p13 }
 0x192   :  { %818 = shalt.err (!%p815_p1)
}
 0x193   :  { %594 = dma.vmem_to_hbm [thread:$0]  %s589_s1, 256, %s906_s2, [#allocation4], %s824_s19, %s824_s19, %s825_s20  }
 0x194   :  { %821 = dma.done.wait [#allocation4], 256  }
 0x195   :  { %822 = vsyncadd [#allocation4], 4294967040 }
 0x196   :  { %598 = vsyncpa [#allocation3], 1 }
 0x197   :  { %599 = vsyncpa [#allocation4], 1 }

</bundles_post_ra>
